<compile_context>
chip_gen: v7x
topology: tpu7x:2x2x1
jax: 0.10.0
libtpu: 0.0.40
codegen_flags: <defaults>
</compile_context>

<pallas_src>
import numpy as np
import jax
import jax.numpy as jnp
from jax.experimental import pallas as pl
from jax.experimental.pallas import tpu as pltpu

try:  # optional: only used for the host-side global connected-component labeling
    from scipy import ndimage as _scipy_ndimage
except Exception:  # pragma: no cover
    _scipy_ndimage = None


# ----------------------------------------------------------------------------
# Host-side topology pass (vectorized numpy).
# TODO(synk): connected-component labeling + the simple-point test are sequential,
# data-dependent graph algorithms with no clean Pallas equivalent; they run on host
# (numpy-vectorized), fed only by 1-byte binary masks.
# ----------------------------------------------------------------------------

def _structure_6():
    s = np.zeros((3, 3, 3), dtype=bool)
    s[1, 1, 1] = s[0, 1, 1] = s[2, 1, 1] = True
    s[1, 0, 1] = s[1, 2, 1] = s[1, 1, 0] = s[1, 1, 2] = True
    return s


def _structure_18():
    s = np.zeros((3, 3, 3), dtype=bool)
    cross = np.array([[0, 1, 0], [1, 1, 1], [0, 1, 0]], dtype=bool)
    s[0] = cross
    s[1] = True
    s[2] = cross
    return s


def _structure_offsets(structure):
    return tuple((dk - 1, dj - 1, di - 1)
                 for dk in range(3) for dj in range(3) for di in range(3)
                 if structure[dk, dj, di] and not (dk == dj == di == 1))


_OFF6 = _structure_offsets(_structure_6())
_OFF18 = _structure_offsets(_structure_18())
_OFF26 = _structure_offsets(np.ones((3, 3, 3), dtype=bool))


def _shift3d(a, axis, d, fill):
    """out[p] = a[p + d*e_axis] where in-bounds, else `fill` (any ndim, one axis)."""
    out = np.full_like(a, fill)
    n = a.shape[axis]
    src = [slice(None)] * a.ndim
    dst = [slice(None)] * a.ndim
    if d >= 0:
        dst[axis] = slice(0, n - d)
        src[axis] = slice(d, n)
    else:
        dst[axis] = slice(-d, n)
        src[axis] = slice(0, n + d)
    out[tuple(dst)] = a[tuple(src)]
    return out


def _label_components_6conn(mask):
    """6-connected component labeling of a 3-D bool mask.

    Labels are arbitrary positive ints, constant per component, 0 for background.
    Uses scipy.ndimage.label when available, else a vectorized numpy min-label
    propagation with pointer jumping (no per-voxel Python loops)."""
    m = np.ascontiguousarray(np.asarray(mask, dtype=bool))
    if _scipy_ndimage is not None:
        lab, _ = _scipy_ndimage.label(m)       # default structure == 6-connectivity
        return lab.astype(np.int32)
    if not m.any():
        return np.zeros(m.shape, dtype=np.int32)
    n = m.size
    big = np.int32(n)
    parent = np.arange(n, dtype=np.int32).reshape(m.shape)
    while True:
        new = parent.copy()
        for axis in range(3):
            for d in (-1, 1):
                nb_parent = _shift3d(parent, axis, d, big)
                nb_mask = _shift3d(m, axis, d, False)
                cand = np.where(m & nb_mask, nb_parent, big)
                np.minimum(new, cand, out=new)
        flat = new.reshape(-1)
        for _ in range(4):                      # pointer jumping (path compression)
            flat = flat[flat]
        new = flat.reshape(m.shape)
        if np.array_equal(new, parent):
            break
        parent = new
    return np.where(m, parent + 1, 0).astype(np.int32)


def _gather_neighborhoods(labeled):
    """All edge-padded 3x3x3 neighborhoods of `labeled` -> (3, 3, 3, K*J*I)."""
    K, J, I = labeled.shape
    padded = np.pad(labeled, 1, mode="edge")
    out = np.empty((3, 3, 3, K * J * I), dtype=labeled.dtype)
    for dk in range(3):
        for dj in range(3):
            for di in range(3):
                out[dk, dj, di] = padded[dk:dk + K, dj:dj + J, di:di + I].reshape(-1)
    return out


def _shift_cube(a, off, fill):
    """out[k,j,i,:] = a[k+dk, j+dj, i+di, :] where in-bounds (3x3x3 cube), else fill."""
    out = np.full_like(a, fill)
    sl = []
    for d in off:
        if d >= 0:
            sl.append((slice(0, 3 - d), slice(d, 3)))
        else:
            sl.append((slice(-d, 3), slice(0, 3 + d)))
    (dk, sk), (dj, sj), (di, si) = sl
    out[dk, dj, di] = a[sk, sj, si]
    return out


def _count_neighborhood_components(active, offsets):
    """Batched connected-component count over many 3x3x3 neighborhoods.

    active: (3,3,3,M) bool; adjacency given by `offsets`.  Returns (M,) counts,
    computed with vectorized min-label propagation (<= 26 hops covers any path)."""
    big = np.int32(27)
    init = np.arange(27, dtype=np.int32).reshape(3, 3, 3, 1)
    labels = np.where(active, init, big)
    for _ in range(26):
        nb_min = np.full_like(labels, big)
        for off in offsets:
            np.minimum(nb_min, _shift_cube(labels, off, big), out=nb_min)
        new = np.where(active, np.minimum(labels, nb_min), big)
        if np.array_equal(new, labels):
            break
        labels = new
    roots = active & (labels == init)
    return roots.sum(axis=(0, 1, 2))


def label_nonsimple_points(binary, chunk=1 << 18):
    """Bool mask of non-simple points of a 3-D binary volume.

    Reference semantics: global 6-connected labeling; a voxel is NON-simple iff its
    label != 0 and either (a) the 18-connected component count of "!= center label"
    in its edge-padded 3x3x3 neighborhood differs from 1, or (b) the 26-connected
    component count of "== center label" minus the center differs from 1."""
    binary = np.asarray(binary, dtype=bool)
    labeled = _label_components_6conn(binary)
    K, J, I = labeled.shape
    N = K * J * I
    neigh = _gather_neighborhoods(labeled)
    nonsimple = np.zeros(N, dtype=bool)
    for s in range(0, N, chunk):                 # chunk to bound host memory
        nb = neigh[..., s:s + chunk]
        center = nb[1, 1, 1]
        fg_cols = np.nonzero(center != 0)[0]
        if fg_cols.size == 0:
            continue
        nb_fg = nb[..., fg_cols]
        c_fg = center[fg_cols]
        n_bg = _count_neighborhood_components(nb_fg != c_fg, _OFF18)
        fg = nb_fg == c_fg
        fg[1, 1, 1] = False
        n_fg = _count_neighborhood_components(fg, _OFF26)
        nonsimple[s + fg_cols] = (n_bg != 1) | (n_fg != 1)
    return nonsimple.reshape(K, J, I)


# ---- slow per-voxel transcription of the reference (test-only validation) -------

def _cc_label_python(mask, offsets):
    m = np.asarray(mask, dtype=bool)
    K, J, I = m.shape
    labels = np.zeros((K, J, I), dtype=np.int32)
    num = 0
    for k0 in range(K):
        for j0 in range(J):
            for i0 in range(I):
                if m[k0, j0, i0] and labels[k0, j0, i0] == 0:
                    num += 1
                    labels[k0, j0, i0] = num
                    stack = [(k0, j0, i0)]
                    while stack:
                        k, j, i = stack.pop()
                        for dk, dj, di in offsets:
                            nk, nj, ni = k + dk, j + dj, i + di
                            if (0 <= nk < K and 0 <= nj < J and 0 <= ni < I
                                    and m[nk, nj, ni] and labels[nk, nj, ni] == 0):
                                labels[nk, nj, ni] = num
                                stack.append((nk, nj, ni))
    return labels, num


def _label_nonsimple_points_slow(binary):
    labeled, _ = _cc_label_python(np.asarray(binary, dtype=bool), _OFF6)
    K, J, I = labeled.shape
    padded = np.pad(labeled, 1, mode="edge")
    out = np.zeros((K, J, I), dtype=bool)
    for k in range(K):
        for j in range(J):
            for i in range(I):
                nb = padded[k:k + 3, j:j + 3, i:i + 3]
                c = nb[1, 1, 1]
                if c == 0:
                    continue
                if _cc_label_python(nb != c, _OFF18)[1] != 1:
                    out[k, j, i] = True
                    continue
                fg = nb == c
                fg[1, 1, 1] = False
                out[k, j, i] = _cc_label_python(fg, _OFF26)[1] != 1
    return out


# ----------------------------------------------------------------------------
# Pallas kernel: simple-point weighting + BCE-with-logits + streamed reduction
# ----------------------------------------------------------------------------

_LANES = 128      # vreg lane width: last dim of the lane-dense layout
_ROW_ALIGN = 32   # int8 native tile is (32, 128) -> row blocks multiple of 32
_LN2 = float(np.log(2.0))


def _weighted_bce_sum_kernel(pred_ref, lab_ref, code_ref, out_ref, acc_ref):
    """One (block_rows, 128) tile: decode weights, stable BCE-with-logits, fold to
    (8, 128) and accumulate.  Grid = (core, tile); `tile` is the streaming reduction
    axis with a persistent (8, 128) VMEM accumulator."""
    t = pl.program_id(1)

    @pl.when(t == 0)
    def _init():
        acc_ref[...] = jnp.zeros_like(acc_ref)

    x_raw = pred_ref[...]                                  # (br, 128) f32 logits
    y_raw = lab_ref[...]                                   # (br, 128) f32 targets
    # int8 code: bit0 = prediction non-simple, bit1 = label non-simple.
    # One upcast to i32 for robust lowering; VALU has slack (kernel is HBM-bound).
    c = code_ref[...].astype(jnp.int32)
    wx = jnp.where((c & 1) != 0, 10.0, 1.0)
    wy = jnp.where((c & 2) != 0, 10.0, 1.0)
    x = wx * x_raw                                         # weighted prediction
    y = wy * y_raw                                         # weighted label
    # numerically stable BCEWithLogits: max(x,0) - x*y + log1p(exp(-|x|))
    per = jnp.maximum(x, 0.0) - x * y + jnp.log1p(jnp.exp(-jnp.abs(x)))
    # Layout-preserving (br,128)->(br/8,8,128) fold; the sum over the leading dim is
    # plain sublane-aligned VPU adds (no XLU) into the tiny persistent accumulator.
    acc_ref[...] += per.reshape(-1, 8, _LANES).sum(axis=0)

    @pl.when(t == pl.num_programs(1) - 1)
    def _finalize():
        out_ref[...] = acc_ref[...]


def _ceil_to(x, m):
    return -(-int(x) // m) * m


def _tensorcores_per_device():
    """2 only where one JAX device exposes two TensorCores (v7x); single-core v5e /
    v6e get 1 (a 2-way split there only adds padding + an extra init/finalize)."""
    try:
        kind = jax.devices()[0].device_kind.lower()
    except Exception:
        return 1
    return 2 if ("v7" in kind or "7x" in kind) else 1


def _pick_block_rows(rows_per_core, requested):
    cap = max(_ROW_ALIGN, (int(requested) // _ROW_ALIGN) * _ROW_ALIGN)
    aligned = _ceil_to(rows_per_core, _ROW_ALIGN)
    if aligned <= cap:
        if aligned >= 2 * _ROW_ALIGN:
            # >= 2 tiles per core so the DMA of tile t+1 overlaps compute of tile t
            return _ceil_to(-(-aligned // 2), _ROW_ALIGN)
        return aligned
    return cap


def simple_point_bce_with_logits_loss(prediction, label, *,
                                      block_rows=8192, core_split=None):
    """Forward pass of SimplePointBCEWithLogitsLoss for 3-D float volumes."""
    pred = jnp.asarray(prediction, dtype=jnp.float32)
    lab = jnp.asarray(label, dtype=jnp.float32)
    assert pred.shape == lab.shape and pred.ndim == 3

    # ---- host topology pass: only 1 B/elem crosses PCIe each way ----------------
    # TODO(synk): global CC labeling + simple-point test are sequential, data-
    # dependent graph algorithms with no clean Pallas equivalent (vectorized numpy
    # on host); this also makes the wrapper non-jittable / non-differentiable.
    pred_bin = np.asarray(jax.device_get(pred > 0.5))
    lab_bin = np.asarray(jax.device_get(lab > 0.5))
    nsp = label_nonsimple_points(pred_bin)
    nsl = label_nonsimple_points(lab_bin)
    code = jnp.asarray(nsp.astype(np.int8) | (nsl.astype(np.int8) << 1))  # 1 B/elem

    n_true = int(np.prod(pred.shape))
    rows = -(-n_true // _LANES)

    P = core_split if core_split is not None else _tensorcores_per_device()
    P = P if rows >= P * _ROW_ALIGN else 1
    rows_per_core = -(-rows // P)
    br = _pick_block_rows(rows_per_core, block_rows)
    tiles = -(-rows_per_core // br)
    rows_pad = P * tiles * br
    n_pad = rows_pad * _LANES
    assert n_pad >= n_true

    # Device-side flatten + ZERO-pad + lane-dense (rows, 128) reshape.  Zero padding
    # is load-bearing: weight 1 and x = y = 0 make every padded element contribute
    # exactly ln(2) to the sum, which is subtracted once below.
    def to2d(a):
        flat = jnp.reshape(a, (-1,))
        flat = jnp.pad(flat, (0, n_pad - n_true))
        return jnp.reshape(flat, (rows_pad, _LANES))

    pred2, lab2, code2 = to2d(pred), to2d(lab), to2d(code)

    imap = lambda p, t: (p * tiles + t, 0)
    grid_spec = pltpu.PrefetchScalarGridSpec(
        num_scalar_prefetch=0,
        grid=(P, tiles),
        in_specs=[pl.BlockSpec((br, _LANES), imap) for _ in range(3)],
        out_specs=pl.BlockSpec((8, _LANES), lambda p, t: (p, 0)),
        scratch_shapes=[pltpu.VMEM((8, _LANES), jnp.float32)],
    )

    # double-buffered inputs: 2 * (4 + 4 + 1) B/elem per (br, 128) tile (+ headroom)
    tile_bytes = 2 * (4 + 4 + 1) * br * _LANES
    vmem_limit = int(min(60 << 20, max(32 << 20, tile_bytes * 13 // 10 + (1 << 20))))

    out = pl.pallas_call(
        _weighted_bce_sum_kernel,
        out_shape=jax.ShapeDtypeStruct((P * 8, _LANES), jnp.float32),
        grid_spec=grid_spec,
        compiler_params=pltpu.CompilerParams(
            dimension_semantics=("parallel", "arbitrary"),
            vmem_limit_bytes=vmem_limit,
        ),
        cost_estimate=pl.CostEstimate(
            flops=12 * n_pad,
            transcendentals=2 * n_pad,
            bytes_accessed=9 * n_pad + P * 8 * _LANES * 4,
        ),
    )(pred2, lab2, code2)

    # Tiny final cross-lane reduce by XLA; remove the padded ln(2) contributions and
    # take the mean over the TRUE element count (BCEWithLogitsLoss 'mean').
    total = jnp.sum(out) - jnp.float32((n_pad - n_true) * _LN2)
    return total / jnp.float32(n_true)


# ----------------------------------------------------------------------------
# Self-check
# ----------------------------------------------------------------------------

if __name__ == "__main__":
    key = jax.random.PRNGKey(0)
    kp, kl, km = jax.random.split(key, 3)

    # 1) Vectorized topology pass vs a direct per-voxel transcription of the
    #    reference module, on a tiny volume.
    small = np.asarray(jax.device_get(jax.random.uniform(km, (5, 7, 9)) > 0.5))
    assert np.array_equal(label_nonsimple_points(small),
                          _label_nonsimple_points_slow(small)), "topology mismatch"

    # 2) End-to-end loss on a small 3-D volume (the module's forward operates on
    #    plain 3-D tensors, no batch/channel dims).
    shape = (12, 40, 64)          # 30720 voxels -> 240 lane-dense rows
    prediction = jax.random.normal(kp, shape, dtype=jnp.float32)
    label = (jax.random.uniform(kl, shape) > 0.5).astype(jnp.float32)

    # numpy reference (float64 accumulation)
    pred_np = np.asarray(jax.device_get(prediction), dtype=np.float64)
    lab_np = np.asarray(jax.device_get(label), dtype=np.float64)
    nsp = label_nonsimple_points(pred_np > 0.5).astype(np.float64)
    nsl = label_nonsimple_points(lab_np > 0.5).astype(np.float64)
    xr = (1.0 + 9.0 * nsp) * pred_np
    yr = (1.0 + 9.0 * nsl) * lab_np
    ref = float((np.maximum(xr, 0.0) - xr * yr + np.log1p(np.exp(-np.abs(xr)))).mean())

    # default configuration (auto core split / auto block size)
    loss = float(jax.block_until_ready(
        simple_point_bce_with_logits_loss(prediction, label)))
    assert np.isfinite(loss) and abs(loss - ref) <= max(1e-3, 2e-3 * abs(ref)), (loss, ref)

    # stress the 2-way core split + multi-tile accumulation + padding-correction path
    loss2 = float(jax.block_until_ready(
        simple_point_bce_with_logits_loss(prediction, label,
                                          block_rows=32, core_split=2)))
    assert abs(loss2 - ref) <= max(1e-3, 2e-3 * abs(ref)), (loss2, ref)

    print("KERNEL_OK")
</pallas_src>

<mosaic_0001>
module attributes {stable_mosaic.version = 11 : i64} {
  func.func @_weighted_bce_sum_kernel(%arg0: i32, %arg1: i32, %arg2: memref<128x128xf32, #tpu.memory_space<vmem>>, %arg3: memref<128x128xf32, #tpu.memory_space<vmem>>, %arg4: memref<128x128xi8, #tpu.memory_space<vmem>>, %arg5: memref<8x128xf32, #tpu.memory_space<vmem>>, %arg6: memref<8x128xf32, #tpu.memory_space<vmem>>) attributes {dimension_semantics = [#tpu.dimension_semantics<parallel>, #tpu.dimension_semantics<arbitrary>], iteration_bounds = array<i64: 1, 2>, scalar_prefetch = 0 : i64, scratch_operands = 1 : i64, tpu.core_type = #tpu.core_type<tc>, window_params = [{transform_indices = @transform_0, window_bounds = array<i64: 128, 128>}, {transform_indices = @transform_1, window_bounds = array<i64: 128, 128>}, {transform_indices = @transform_2, window_bounds = array<i64: 128, 128>}, {transform_indices = @transform_3, window_bounds = array<i64: 8, 128>}]} {
    %c0_i32 = arith.constant 0 : i32
    %0 = arith.cmpi eq, %arg1, %c0_i32 : i32
    %1 = arith.extui %0 : i1 to i32
    %c0_i32_0 = arith.constant 0 : i32
    %2 = arith.cmpi ne, %1, %c0_i32_0 : i32
    scf.if %2 {
      %cst_20 = arith.constant 0.000000e+00 : f32
      %41 = vector.broadcast %cst_20 : f32 to vector<8x128xf32>
      %c0_21 = arith.constant 0 : index
      %c0_22 = arith.constant 0 : index
      %42 = vector.load %arg6[%c0_21, %c0_22] : memref<8x128xf32, #tpu.memory_space<vmem>>, vector<8x128xf32>
      tpu.vector_store %arg6[%c0_21, %c0_22], %41 {strides = array<i32>} : memref<8x128xf32, #tpu.memory_space<vmem>>, vector<8x128xf32>,
    } else {
    }
    %c0 = arith.constant 0 : index
    %c0_1 = arith.constant 0 : index
    %3 = vector.load %arg2[%c0, %c0_1] : memref<128x128xf32, #tpu.memory_space<vmem>>, vector<128x128xf32>
    %c0_2 = arith.constant 0 : index
    %c0_3 = arith.constant 0 : index
    %4 = vector.load %arg3[%c0_2, %c0_3] : memref<128x128xf32, #tpu.memory_space<vmem>>, vector<128x128xf32>
    %c0_4 = arith.constant 0 : index
    %c0_5 = arith.constant 0 : index
    %5 = vector.load %arg4[%c0_4, %c0_5] : memref<128x128xi8, #tpu.memory_space<vmem>>, vector<128x128xi8>
    %6 = arith.extsi %5 : vector<128x128xi8> to vector<128x128xi32>
    %c1_i32 = arith.constant 1 : i32
    %7 = vector.broadcast %c1_i32 : i32 to vector<128x128xi32>
    %8 = arith.andi %6, %7 : vector<128x128xi32>
    %c0_i32_6 = arith.constant 0 : i32
    %9 = vector.broadcast %c0_i32_6 : i32 to vector<128x128xi32>
    %10 = arith.cmpi ne, %8, %9 : vector<128x128xi32>
    %cst = arith.constant 1.000000e+01 : f32
    %cst_7 = arith.constant 1.000000e+00 : f32
    %11 = vector.broadcast %cst : f32 to vector<128x128xf32>
    %12 = vector.broadcast %cst_7 : f32 to vector<128x128xf32>
    %13 = arith.select %10, %11, %12 : vector<128x128xi1>, vector<128x128xf32>
    %c2_i32 = arith.constant 2 : i32
    %14 = vector.broadcast %c2_i32 : i32 to vector<128x128xi32>
    %15 = arith.andi %6, %14 : vector<128x128xi32>
    %c0_i32_8 = arith.constant 0 : i32
    %16 = vector.broadcast %c0_i32_8 : i32 to vector<128x128xi32>
    %17 = arith.cmpi ne, %15, %16 : vector<128x128xi32>
    %cst_9 = arith.constant 1.000000e+01 : f32
    %cst_10 = arith.constant 1.000000e+00 : f32
    %18 = vector.broadcast %cst_9 : f32 to vector<128x128xf32>
    %19 = vector.broadcast %cst_10 : f32 to vector<128x128xf32>
    %20 = arith.select %17, %18, %19 : vector<128x128xi1>, vector<128x128xf32>
    %21 = arith.mulf %13, %3 : vector<128x128xf32>
    %22 = arith.mulf %20, %4 : vector<128x128xf32>
    %cst_11 = arith.constant 0.000000e+00 : f32
    %23 = vector.broadcast %cst_11 : f32 to vector<128x128xf32>
    %24 = arith.maximumf %21, %23 : vector<128x128xf32>
    %25 = arith.mulf %21, %22 : vector<128x128xf32>
    %26 = arith.subf %24, %25 : vector<128x128xf32>
    %27 = math.absf %21 : vector<128x128xf32>
    %cst_12 = arith.constant 0.000000e+00 : f32
    %28 = vector.broadcast %cst_12 : f32 to vector<128x128xf32>
    %29 = arith.subf %28, %27 : vector<128x128xf32>
    %30 = math.exp %29 : vector<128x128xf32>
    %31 = math.log1p %30 : vector<128x128xf32>
    %32 = arith.addf %26, %31 : vector<128x128xf32>
    %c0_13 = arith.constant 0 : index
    %c0_14 = arith.constant 0 : index
    %33 = vector.load %arg6[%c0_13, %c0_14] : memref<8x128xf32, #tpu.memory_space<vmem>>, vector<8x128xf32>
    %34 = vector.shape_cast %32 : vector<128x128xf32> to vector<16x8x128xf32>
    %cst_15 = arith.constant dense<0.000000e+00> : vector<8x128xf32>
    %35 = vector.multi_reduction <add>, %34, %cst_15 [0] : vector<16x8x128xf32> to vector<8x128xf32>
    %36 = arith.addf %33, %35 : vector<8x128xf32>
    %c0_16 = arith.constant 0 : index
    %c0_17 = arith.constant 0 : index
    %37 = vector.load %arg6[%c0_16, %c0_17] : memref<8x128xf32, #tpu.memory_space<vmem>>, vector<8x128xf32>
    tpu.vector_store %arg6[%c0_16, %c0_17], %36 {strides = array<i32>} : memref<8x128xf32, #tpu.memory_space<vmem>>, vector<8x128xf32>,
    %c1_i32_18 = arith.constant 1 : i32
    %38 = arith.cmpi eq, %arg1, %c1_i32_18 : i32
    %39 = arith.extui %38 : i1 to i32
    %c0_i32_19 = arith.constant 0 : i32
    %40 = arith.cmpi ne, %39, %c0_i32_19 : i32
    scf.if %40 {
      %c0_20 = arith.constant 0 : index
      %c0_21 = arith.constant 0 : index
      %41 = vector.load %arg6[%c0_20, %c0_21] : memref<8x128xf32, #tpu.memory_space<vmem>>, vector<8x128xf32>
      %c0_22 = arith.constant 0 : index
      %c0_23 = arith.constant 0 : index
      %42 = vector.load %arg5[%c0_22, %c0_23] : memref<8x128xf32, #tpu.memory_space<vmem>>, vector<8x128xf32>
      tpu.vector_store %arg5[%c0_22, %c0_23], %41 {strides = array<i32>} : memref<8x128xf32, #tpu.memory_space<vmem>>, vector<8x128xf32>,
    } else {
    }
    return
  }
  func.func @transform_0(%arg0: i32, %arg1: i32) -> (i32, i32) {
    %c2_i32 = arith.constant 2 : i32
    %0 = arith.muli %arg0, %c2_i32 : i32
    %1 = arith.addi %0, %arg1 : i32
    %c0_i32 = arith.constant 0 : i32
    %c0_i32_0 = arith.constant 0 : i32
    return %1, %c0_i32 : i32, i32
  }
  func.func @transform_1(%arg0: i32, %arg1: i32) -> (i32, i32) {
    %c2_i32 = arith.constant 2 : i32
    %0 = arith.muli %arg0, %c2_i32 : i32
    %1 = arith.addi %0, %arg1 : i32
    %c0_i32 = arith.constant 0 : i32
    %c0_i32_0 = arith.constant 0 : i32
    return %1, %c0_i32 : i32, i32
  }
  func.func @transform_2(%arg0: i32, %arg1: i32) -> (i32, i32) {
    %c2_i32 = arith.constant 2 : i32
    %0 = arith.muli %arg0, %c2_i32 : i32
    %1 = arith.addi %0, %arg1 : i32
    %c0_i32 = arith.constant 0 : i32
    %c0_i32_0 = arith.constant 0 : i32
    return %1, %c0_i32 : i32, i32
  }
  func.func @transform_3(%arg0: i32, %arg1: i32) -> (i32, i32) {
    %c0_i32 = arith.constant 0 : i32
    %c0_i32_0 = arith.constant 0 : i32
    return %arg0, %c0_i32 : i32, i32
  }
}

</mosaic_0001>

<bundles_post_ra>
// kernel: tpu_custom_call.1
= control target key start
LH: loop header
LB: loop body
LE: loop exit
PB: predicated region body
PF: predicated region fallthrough
CT: control target
= control target key end

     0   :  { %8 = vsyncpa [#allocation4], 0  ;;  %s2114_s0 = inlined_call_operand.hbm [shape: f32[256,128], index: 0, kind: input, shape index: {}]   ;;  %s2115_s1 = inlined_call_operand.hbm [shape: f32[256,128], index: 1, kind: input, shape index: {}]   ;;  %s2116_s2 = inlined_call_operand.hbm [shape: s8[256,128], index: 2, kind: input, shape index: {}]   ;;  %s2117_s3 = inlined_call_operand.hbm [shape: f32[8,128], index: 3, kind: output, shape index: {}]  }
   0x1   :  { %10 = vsyncpa [#allocation4 + $0x1], 0 }
   0x2   :  { %11 = vsyncpa [#allocation7], 0 }
   0x3   :  { %13 = vsyncpa [#allocation7 + $0x1], 0 }
   0x4   :  { %14 = vsyncpa [#allocation5], 0  ;;  %s1267_s12 = smov 0   ;;  %s1269_s13 = smov 0  }
   0x5   :  { %s1271_s14 = smov 0   ;;  %s1273_s15 = smov 0  }
   0x6   :  { %s1275_s16 = smov 0   ;;  %s1277_s17 = smov 0  }
   0x7 LB: > { %s1296_s18 = sadd.s32 4294967295, %s1237_s17   ;;  %s29_s19 = sadd.s32 1, %s1233_s16  ;;  %s1237_s17 = sphi %s1277_s17, %s20_s17   ;;  %s1233_s16 = sphi %s1275_s16, %s2165_s16   ;;  %s1229_s15 = sphi %s1273_s15, %s2164_s15   ;;  %s1225_s14 = sphi %s1271_s14, %s2163_s14   ;;  %s1221_s13 = sphi %s1269_s13, %s2162_s13   ;;  %s1217_s12 = sphi %s1267_s12, %s2161_s12  }
   0x8   : > { %p30_p0 = scmp.ge.s32.totalorder %s29_s19, 2  ;;  %s43_s20 = sadd.s32 1, %s1225_s14 }
   0x9   : > { %p50_p1 = scmp.ne.s32.totalorder %s1225_s14, %s1221_s13  ;;  %p51_p2 = scmp.eq.s32.totalorder %s1237_s17, 0 }
   0xa   : > { %s2167_s19 = smov (%p30_p0, %s29_s19), 0  ;;  %p56_p4 = scmp.ne.s32.totalorder %s1221_s13, %s1217_s12 }
   0xb   : > { %p52_p3 = por %p51_p2, %p50_p1  ;;  %s40_s21 = ssub.s32 %s1233_s16, %s2167_s19 }
   0xc   : > { %p57_p5 = scmp.eq.s32.totalorder %s1296_s18, 0  ;;  %p41_p6 = scmp.eq.s32.totalorder %s40_s21, 0 }
   0xd   : > { %p943_p8 = scmp.lt.s32.totalorder %s1237_s17, 2  ;;  %s1318_s24 = sand.u32 1, %s1225_s14  }
   0xe   : > { %p1309_p7 = por %p57_p5, %p56_p4  ;;  %s920_s25 = sshll.u32 %s1233_s16, 11 }
   0xf   : > { %s1315_s23 = scalar_select %p41_p6, %s1225_s14, %s43_s20  }
  0x10   : > { %s2121_s22 = scalar_select %p1309_p7, 1, 0 }
  0x11   : > { %s901_s26 = sshll.u32 %s1318_s24, 7  ;;  %p1322_p9 = pnand %p943_p8, %p52_p3 }
  0x12   : > { %s189_s28 = sand.u32 1, %s1237_s17   ;;  %s1332_s4 = scalar_lea.hbm %s2115_s1, %s920_s25 }
  0x13   : > { %s193_s5 = scalar_lea.vmem [#allocation6], %s901_s26  ;;  %s1339_s7 = scalar_lea.sflag [#allocation7], %s189_s28 }
  0x14   : > { %s202_s6 = sshll.u32 %s193_s5, 4  ;;  %s1063_s8 = scalar_lea.hbm %s1332_s4, 2048  ;;  %s1336_s6 = int_to_ptr.vmem [resolvable:$true] %s202_s6 }
  0x15   : > { %p1064_p11 = scmp.ne.s32.totalorder %s1332_s4, %s1063_s8  ;;  %p1345_p12 = pneg %p1322_p9 }
  0x16   : > { %s1068_s12 = scalar_lea.hbm %s2115_s1, 4096  ;;  %p1069_p1 = scmp.lt.u32.totalorder %s1332_s4, %s2115_s1 }
  0x17   : > { %p1066_p13 = pnand %p1345_p12, %p1064_p11  ;;  %p1070_p2 = scmp.lt.u32.totalorder %s1068_s12, %s1063_s8 }
  0x18   : > { %p1072_p4 = scmp.lt.u32.totalorder %s1063_s8, %s1332_s4 }
  0x19   : > { %p1067_p0 = pneg %p1066_p13  ;;  %p1071_p3 = por %p1070_p2, %p1069_p1 }
  0x1b   : > { %p1073_p5 = por %p1072_p4, %p1071_p3 }
  0x1d   : > { %p1074_p6 = pnand %p1073_p5, %p1067_p0 }
  0x1f   : > { %1077 = shalt.err (!%p1074_p6)
}
  0x20   : > { %s1078_s28 = scalar_lea.vmem %s1336_s6, 2048  ;;  %s1239_s29 = smov [#allocation6]  }
  0x21   : > { %p1079_p8 = scmp.ne.s32.totalorder %s1336_s6, %s1078_s28  ;;  %s1083_s30 = sshll.u32 %s1239_s29, 4  ;;  %s1084_s30 = int_to_ptr.vmem [resolvable:$false] %s1083_s30 }
  0x22   : > { %s1085_s5 = scalar_lea.vmem %s1084_s30, 4096  ;;  %p1086_p10 = scmp.lt.s32.totalorder %s1336_s6, %s1084_s30 }
  0x23   : > { %p1081_p11 = pnand %p1079_p8, %p1345_p12  ;;  %p1087_p7 = scmp.lt.s32.totalorder %s1085_s5, %s1078_s28 }
  0x25   : > { %p1082_p13 = pneg %p1081_p11  ;;  %p1088_p1 = por %p1087_p7, %p1086_p10 }
  0x27   : > { %p1089_p2 = pnand %p1088_p1, %p1082_p13 }
  0x29   : > { %1092 = shalt.err (!%p1089_p2)
}
  0x2a   : > { %s2119_s8 = smov 128   ;;  %s1241_s10 = smov 8  }
  0x2b   : > { %939 = dma.hbm_to_vmem [thread:$0]  (!%p1322_p9), %s1332_s4, 2048, %s1336_s6, %s1339_s7, %s2119_s8, %s2119_s8, %s1241_s10  }
  0x2c   : > { %p233_p7 = scmp.lt.s32.totalorder %s1237_s17, 3  ;;  %p2124_p10 = scmp.ge.s32.totalorder %s1237_s17, 1 }
  0x2d   : > { %s1384_s21 = scalar_lea.hbm %s2114_s0, %s920_s25  ;;  %s170_s28 = scalar_lea.vmem [#allocation3], %s901_s26 }
  0x2e   : > { %p1375_p0 = pnand %p2124_p10, %p233_p7  ;;  %s179_s29 = sshll.u32 %s170_s28, 4  ;;  %s1388_s29 = int_to_ptr.vmem [resolvable:$true] %s179_s29 }
  0x2f   : > { %s907_s4 = sshll.u32 %s1318_s24, 5  ;;  %s167_s6 = scalar_lea.sflag [#allocation4], %s1318_s24 }
  0x30   : > { %s2125_s11 = scalar_select %p1375_p0, 1, 0 }
  0x31   : > { %s1093_s30 = scalar_lea.hbm %s1384_s21, 2048  ;;  %s1098_s25 = scalar_lea.hbm %s2114_s0, 4096 }
  0x32   : > { %p1094_p3 = scmp.ne.s32.totalorder %s1384_s21, %s1093_s30  ;;  %p1099_p6 = scmp.lt.u32.totalorder %s1384_s21, %s2114_s0 }
  0x33   : > { %p1100_p8 = scmp.lt.u32.totalorder %s1098_s25, %s1093_s30  ;;  %p1102_p13 = scmp.lt.u32.totalorder %s1093_s30, %s1384_s21 }
  0x34   : > { %p1096_p4 = pnand %p1094_p3, %p1345_p12 }
  0x35   : > { %p1101_p11 = por %p1100_p8, %p1099_p6 }
  0x36   : > { %p1097_p5 = pneg %p1096_p4 }
  0x37   : > { %p1103_p1 = por %p1102_p13, %p1101_p11 }
  0x39   : > { %p1104_p2 = pnand %p1103_p1, %p1097_p5 }
  0x3b   : > { %1107 = shalt.err (!%p1104_p2)
}
  0x3c   : > { %s1108_s26 = scalar_lea.vmem %s1388_s29, 2048  ;;  %s1242_s28 = smov [#allocation3]  }
  0x3d   : > { %p1109_p7 = scmp.ne.s32.totalorder %s1388_s29, %s1108_s26  ;;  %s1113_s5 = sshll.u32 %s1242_s28, 4  ;;  %s1114_s5 = int_to_ptr.vmem [resolvable:$false] %s1113_s5 }
  0x3e   : > { %s1115_s8 = scalar_lea.vmem %s1114_s5, 4096  ;;  %p1116_p4 = scmp.lt.s32.totalorder %s1388_s29, %s1114_s5 }
  0x3f   : > { %p1111_p10 = pnand %p1109_p7, %p1345_p12  ;;  %p1117_p0 = scmp.lt.s32.totalorder %s1115_s8, %s1108_s26 }
  0x41   : > { %p1112_p3 = pneg %p1111_p10  ;;  %p1118_p6 = por %p1117_p0, %p1116_p4 }
  0x43   : > { %p1119_p8 = pnand %p1118_p6, %p1112_p3 }
  0x45   : > { %1122 = shalt.err (!%p1119_p8)
}
  0x46   : > { %s2126_s30 = smov 128   ;;  %s922_s12 = sshll.u32 %s1233_s16, 9 }
  0x47   : > { %936 = dma.hbm_to_vmem [thread:$0]  (!%p1322_p9), %s1384_s21, 2048, %s1388_s29, %s167_s6, %s2126_s30, %s2126_s30, %s1241_s10  }
  0x48   : > { %s1422_s26 = scalar_lea.hbm %s2116_s2, %s922_s12  ;;  %s216_s28 = scalar_lea.vmem [#allocation8], %s907_s4 }
  0x49   : > { %s225_s5 = sshll.u32 %s216_s28, 4  ;;  %s1123_s8 = scalar_lea.hbm %s1422_s26, 512  ;;  %s1426_s5 = int_to_ptr.vmem [resolvable:$true] %s225_s5 }
  0x4a   : > { %p1124_p0 = scmp.ne.s32.totalorder %s1422_s26, %s1123_s8  ;;  %s1128_s6 = scalar_lea.hbm %s2116_s2, 1024 }
  0x4b   : > { %p1129_p13 = scmp.lt.u32.totalorder %s1422_s26, %s2116_s2  ;;  %p1130_p1 = scmp.lt.u32.totalorder %s1128_s6, %s1123_s8 }
  0x4c   : > { %p1126_p5 = pnand %p1124_p0, %p1345_p12  ;;  %p1132_p7 = scmp.lt.u32.totalorder %s1123_s8, %s1422_s26 }
  0x4d   : > { %p1131_p2 = por %p1130_p1, %p1129_p13 }
  0x4e   : > { %p1127_p11 = pneg %p1126_p5 }
  0x4f   : > { %p1133_p10 = por %p1132_p7, %p1131_p2 }
  0x51   : > { %p1134_p3 = pnand %p1133_p10, %p1127_p11 }
  0x53   : > { %1137 = shalt.err (!%p1134_p3)
}
  0x54   : > { %s1138_s24 = scalar_lea.vmem %s1426_s5, 512  ;;  %s1243_s4 = smov [#allocation8]  }
  0x55   : > { %p1139_p4 = scmp.ne.s32.totalorder %s1426_s5, %s1138_s24  ;;  %s1143_s20 = sshll.u32 %s1243_s4, 4  ;;  %s1144_s20 = int_to_ptr.vmem [resolvable:$false] %s1143_s20 }
  0x56   : > { %s1145_s28 = scalar_lea.vmem %s1144_s20, 1024  ;;  %p1146_p0 = scmp.lt.s32.totalorder %s1426_s5, %s1144_s20 }
  0x57   : > { %p1141_p6 = pnand %p1139_p4, %p1345_p12  ;;  %p1147_p5 = scmp.lt.s32.totalorder %s1145_s28, %s1138_s24 }
  0x59   : > { %p1142_p8 = pneg %p1141_p6  ;;  %p1148_p13 = por %p1147_p5, %p1146_p0 }
  0x5b   : > { %p1149_p1 = pnand %p1148_p13, %p1142_p8 }
  0x5d   : > { %1152 = shalt.err (!%p1149_p1)
}
  0x5e   : > { %942 = dma.hbm_to_vmem [thread:$0]  (!%p1322_p9), %s1422_s26, 512, %s1426_s5, %s1339_s7, %s2126_s30, %s2126_s30, %s1241_s10  }
  0x5f   : > { %p2127_p12 = scmp.ne.s32.totalorder %s2125_s11, 0 }
  0x60   : > { %s239_s9 = sand.u32 (!%p2127_p12), 1, %s1221_s13   ;;  %p2128_p11 = scmp.ne.s32.totalorder (!%p2127_p12), %s2121_s22, 0 }
  0x61   : > { %237 = sbr.rel (%p2127_p12) target bundleno = 270 (0x10e), region = 32  ;;  %s911_s8 = sshll.u32 (!%p2127_p12), %s239_s9, 7 }
  0x62   : > { %s240_s21 = scalar_lea.sflag (!%p2127_p12), [#allocation4], %s239_s9  ;;  %s1456_s29 = scalar_lea.vmem (!%p2127_p12), [#allocation3], %s911_s8 }
  0x68   : > { %1204 = dma.done.wait (%p2128_p11), %s240_s21, 2048  }
  0x69   : > { %1206 = vsyncadd (%p2128_p11), %s240_s21, 4294965248  ;;  %s248_s27 = sand.u32 1, %s1296_s18   ;;  %s1463_s7 = scalar_lea.vmem [#allocation6], %s911_s8 }
  0x6a   : > { %s249_s6 = scalar_lea.sflag [#allocation7], %s248_s27 }
  0x6b   : > { %1208 = dma.done.wait (%p2128_p11), %s249_s6, 2560  }
  0x6c   : > { %1210 = vsyncadd (%p2128_p11), %s249_s6, 4294964736  ;;  %s913_s10 = sshll.u32 %s239_s9, 5  ;;  %p914_p9 = scmp.ne.s32.totalorder %s1229_s15, 0 }
  0x6d   : > { %s261_s11 = scalar_lea.vmem [#allocation8], %s913_s10  ;;  %v1244_v0 = vmov (!%p914_p9), 0.0  }
  0x6e   : > { %301 = sbr.rel (%p914_p9) target bundleno = 117 (0x75), region = 48  ;;  %302 = vst [vmem:[#allocation2] sm:$0xff] (!%p914_p9), %v1244_v0 }
  0x75 PF: > { %v1470_v1 = vld [vmem:[%s261_s11] sm:$0xff]  ;;  %v1472_v2 = vld [vmem:[%s261_s11 + $0x8] sm:$0xff]  ;;  %v1474_v3 = vld [vmem:[%s261_s11 + $0x10] sm:$0xff]  ;;  %v1245_v37 = vmov 1.0   ;;  %p915_p2 = scmp.ne.s32.totalorder %s1229_s15, 1 }
  0x76   : > { %v1476_v4 = vld [vmem:[%s261_s11 + $0x18] sm:$0xff]  ;;  %v339_v5 = vunpack.c.0.s8 %v1470_v1  ;;  %v340_v6 = vunpack.c.1.s8 %v1470_v1  ;;  %v341_v7 = vunpack.c.2.s8 %v1470_v1  ;;  %v342_v8 = vunpack.c.3.s8 %v1470_v1 }
  0x77   : > { %v343_v9 = vunpack.c.0.s8 %v1472_v2  ;;  %v344_v10 = vunpack.c.1.s8 %v1472_v2  ;;  %v345_v11 = vunpack.c.2.s8 %v1472_v2  ;;  %v346_v12 = vunpack.c.3.s8 %v1472_v2 }
  0x78   : > { %v347_v13 = vunpack.c.0.s8 %v1474_v3  ;;  %v348_v14 = vunpack.c.1.s8 %v1474_v3  ;;  %v349_v15 = vunpack.c.2.s8 %v1474_v3  ;;  %v350_v16 = vunpack.c.3.s8 %v1474_v3  ;;  %v303_v3 = vld [vmem:[%s1456_s29] sm:$0xff] }
  0x79   : > { %v351_v17 = vunpack.c.0.s8 %v1476_v4  ;;  %v352_v18 = vunpack.c.1.s8 %v1476_v4  ;;  %v353_v19 = vunpack.c.2.s8 %v1476_v4  ;;  %v354_v20 = vunpack.c.3.s8 %v1476_v4  ;;  %v304_v4 = vld [vmem:[%s1456_s29 + $0x8] sm:$0xff] }
  0x7a   : > { %v355_v21 = vand.u32 1, %v339_v5  ;;  %v356_v22 = vand.u32 1, %v340_v6  ;;  %v357_v23 = vand.u32 1, %v341_v7  ;;  %v358_v24 = vand.u32 1, %v342_v8 }
  0x7b   : > { %v359_v25 = vand.u32 1, %v343_v9  ;;  %v360_v26 = vand.u32 1, %v344_v10  ;;  %v361_v27 = vand.u32 1, %v345_v11  ;;  %v362_v28 = vand.u32 1, %v346_v12 }
  0x7c   : > { %v363_v29 = vand.u32 1, %v347_v13  ;;  %v364_v30 = vand.u32 1, %v348_v14  ;;  %v365_v31 = vand.u32 1, %v349_v15  ;;  %v366_v32 = vand.u32 1, %v350_v16 }
  0x7d   : > { %v367_v33 = vand.u32 1, %v351_v17  ;;  %v368_v34 = vand.u32 1, %v352_v18  ;;  %v369_v35 = vand.u32 1, %v353_v19  ;;  %v370_v36 = vand.u32 1, %v354_v20 }
  0x7e   : > { %vm371_vm0 = vcmp.ne.s32.totalorder %v355_v21, 0  ;;  %vm372_vm1 = vcmp.ne.s32.totalorder %v356_v22, 0  ;;  %vm373_vm2 = vcmp.ne.s32.totalorder %v357_v23, 0  ;;  %vm374_vm3 = vcmp.ne.s32.totalorder %v358_v24, 0  ;;  %v312_v22 = vld [vmem:[%s1456_s29 + $0x48] sm:$0xff]  ;;  %v313_v23 = vld [vmem:[%s1456_s29 + $0x50] sm:$0xff] }
  0x7f   : > { %vm375_vm4 = vcmp.ne.s32.totalorder %v359_v25, 0  ;;  %vm376_vm5 = vcmp.ne.s32.totalorder %v360_v26, 0  ;;  %vm377_vm6 = vcmp.ne.s32.totalorder %v361_v27, 0  ;;  %vm378_vm7 = vcmp.ne.s32.totalorder %v362_v28, 0  ;;  %v314_v28 = vld [vmem:[%s1456_s29 + $0x58] sm:$0xff] }
  0x80   : > { %vm379_vm8 = vcmp.ne.s32.totalorder %v363_v29, 0  ;;  %vm380_vm9 = vcmp.ne.s32.totalorder %v364_v30, 0  ;;  %vm381_vm10 = vcmp.ne.s32.totalorder %v365_v31, 0  ;;  %vm382_vm11 = vcmp.ne.s32.totalorder %v366_v32, 0  ;;  %v315_v29 = vld [vmem:[%s1456_s29 + $0x60] sm:$0xff] }
  0x81   : > { %vm383_vm12 = vcmp.ne.s32.totalorder %v367_v33, 0  ;;  %vm384_vm13 = vcmp.ne.s32.totalorder %v368_v34, 0  ;;  %vm385_vm14 = vcmp.ne.s32.totalorder %v369_v35, 0  ;;  %vm386_vm15 = vcmp.ne.s32.totalorder %v370_v36, 0  ;;  %v316_v34 = vld [vmem:[%s1456_s29 + $0x68] sm:$0xff]  ;;  %v317_v35 = vld [vmem:[%s1456_s29 + $0x70] sm:$0xff] }
  0x82   : > { %v1528_v38 = vsel %vm371_vm0, 10.0, %v1245_v37  ;;  %v1532_v39 = vsel %vm372_vm1, 10.0, %v1245_v37  ;;  %v1536_v40 = vsel %vm373_vm2, 10.0, %v1245_v37  ;;  %v1540_v41 = vsel %vm374_vm3, 10.0, %v1245_v37  ;;  %v318_v36 = vld [vmem:[%s1456_s29 + $0x78] sm:$0xff] }
  0x83   : > { %v1544_v42 = vsel %vm375_vm4, 10.0, %v1245_v37  ;;  %v1548_v43 = vsel %vm376_vm5, 10.0, %v1245_v37  ;;  %v1552_v44 = vsel %vm377_vm6, 10.0, %v1245_v37  ;;  %v1556_v45 = vsel %vm378_vm7, 10.0, %v1245_v37 }
  0x84   : > { %v1560_v46 = vsel %vm379_vm8, 10.0, %v1245_v37  ;;  %v1564_v47 = vsel %vm380_vm9, 10.0, %v1245_v37  ;;  %v1568_v48 = vsel %vm381_vm10, 10.0, %v1245_v37  ;;  %v1572_v49 = vsel %vm382_vm11, 10.0, %v1245_v37 }
  0x85   : > { %v1576_v50 = vsel %vm383_vm12, 10.0, %v1245_v37  ;;  %v1580_v51 = vsel %vm384_vm13, 10.0, %v1245_v37  ;;  %v1584_v52 = vsel %vm385_vm14, 10.0, %v1245_v37  ;;  %v1588_v53 = vsel %vm386_vm15, 10.0, %v1245_v37 }
  0x86   : > { %v403_v54 = vand.u32 2, %v339_v5  ;;  %v404_v55 = vand.u32 2, %v340_v6  ;;  %v405_v56 = vand.u32 2, %v341_v7  ;;  %v406_v57 = vand.u32 2, %v342_v8  ;;  %v305_v8 = vld [vmem:[%s1456_s29 + $0x10] sm:$0xff] }
  0x87   : > { %v407_v58 = vand.u32 2, %v343_v9  ;;  %v408_v59 = vand.u32 2, %v344_v10  ;;  %v409_v60 = vand.u32 2, %v345_v11  ;;  %v410_v61 = vand.u32 2, %v346_v12  ;;  %v306_v9 = vld [vmem:[%s1456_s29 + $0x18] sm:$0xff]  ;;  %v307_v10 = vld [vmem:[%s1456_s29 + $0x20] sm:$0xff] }
  0x88   : > { %v411_v62 = vand.u32 2, %v347_v13  ;;  %v412_v63 = vand.u32 2, %v348_v14  ;;  %v413_v0 = vand.u32 2, %v349_v15  ;;  %v414_v1 = vand.u32 2, %v350_v16  ;;  %v308_v11 = vld [vmem:[%s1456_s29 + $0x28] sm:$0xff]  ;;  %v309_v12 = vld [vmem:[%s1456_s29 + $0x30] sm:$0xff] }
  0x89   : > { %v415_v5 = vand.u32 2, %v351_v17  ;;  %v416_v2 = vand.u32 2, %v352_v18  ;;  %v417_v6 = vand.u32 2, %v353_v19  ;;  %v418_v7 = vand.u32 2, %v354_v20  ;;  %v310_v16 = vld [vmem:[%s1456_s29 + $0x38] sm:$0xff]  ;;  %v311_v17 = vld [vmem:[%s1456_s29 + $0x40] sm:$0xff] }
  0x8a   : > { %vm419_vm0 = vcmp.ne.s32.totalorder %v403_v54, 0  ;;  %vm420_vm1 = vcmp.ne.s32.totalorder %v404_v55, 0  ;;  %vm421_vm2 = vcmp.ne.s32.totalorder %v405_v56, 0  ;;  %vm422_vm3 = vcmp.ne.s32.totalorder %v406_v57, 0 }
  0x8b   : > { %vm423_vm4 = vcmp.ne.s32.totalorder %v407_v58, 0  ;;  %vm424_vm5 = vcmp.ne.s32.totalorder %v408_v59, 0  ;;  %vm425_vm6 = vcmp.ne.s32.totalorder %v409_v60, 0  ;;  %vm426_vm7 = vcmp.ne.s32.totalorder %v410_v61, 0  ;;  %v319_v58 = vld [vmem:[%s1463_s7] sm:$0xff]  ;;  %v320_v59 = vld [vmem:[%s1463_s7 + $0x8] sm:$0xff] }
  0x8c   : > { %vm427_vm8 = vcmp.ne.s32.totalorder %v411_v62, 0  ;;  %vm428_vm9 = vcmp.ne.s32.totalorder %v412_v63, 0  ;;  %vm429_vm10 = vcmp.ne.s32.totalorder %v413_v0, 0  ;;  %vm430_vm11 = vcmp.ne.s32.totalorder %v414_v1, 0  ;;  %v321_v60 = vld [vmem:[%s1463_s7 + $0x10] sm:$0xff]  ;;  %v323_v62 = vld [vmem:[%s1463_s7 + $0x20] sm:$0xff] }
  0x8d   : > { %vm431_vm12 = vcmp.ne.s32.totalorder %v415_v5, 0  ;;  %vm432_vm13 = vcmp.ne.s32.totalorder %v416_v2, 0  ;;  %vm433_vm14 = vcmp.ne.s32.totalorder %v417_v6, 0  ;;  %vm434_vm15 = vcmp.ne.s32.totalorder %v418_v7, 0  ;;  %v324_v63 = vld [vmem:[%s1463_s7 + $0x28] sm:$0xff]  ;;  %v326_v1 = vld [vmem:[%s1463_s7 + $0x38] sm:$0xff] }
  0x8e   : > { %v435_v13 = vsel %vm419_vm0, 10.0, %v1245_v37  ;;  %v436_v14 = vsel %vm420_vm1, 10.0, %v1245_v37  ;;  %v437_v15 = vsel %vm421_vm2, 10.0, %v1245_v37  ;;  %v438_v18 = vsel %vm422_vm3, 10.0, %v1245_v37  ;;  %v327_v5 = vld [vmem:[%s1463_s7 + $0x40] sm:$0xff]  ;;  %v329_v6 = vld [vmem:[%s1463_s7 + $0x50] sm:$0xff] }
  0x8f   : > { %v439_v19 = vsel %vm423_vm4, 10.0, %v1245_v37  ;;  %v440_v20 = vsel %vm424_vm5, 10.0, %v1245_v37  ;;  %v441_v21 = vsel %vm425_vm6, 10.0, %v1245_v37  ;;  %v442_v24 = vsel %vm426_vm7, 10.0, %v1245_v37  ;;  %v330_v7 = vld [vmem:[%s1463_s7 + $0x58] sm:$0xff] }
  0x90   : > { %v443_v25 = vsel %vm427_vm8, 10.0, %v1245_v37  ;;  %v444_v26 = vsel %vm428_vm9, 10.0, %v1245_v37  ;;  %v445_v27 = vsel %vm429_vm10, 10.0, %v1245_v37  ;;  %v446_v30 = vsel %vm430_vm11, 10.0, %v1245_v37 }
  0x91   : > { %v447_v31 = vsel %vm431_vm12, 10.0, %v1245_v37  ;;  %v448_v32 = vsel %vm432_vm13, 10.0, %v1245_v37  ;;  %v449_v33 = vsel %vm433_vm14, 10.0, %v1245_v37  ;;  %v450_v54 = vsel %vm434_vm15, 10.0, %v1245_v37 }
  0x92   : > { %v1671_v55 = vmul.f32 %v1528_v38, %v303_v3  ;;  %v1674_v56 = vmul.f32 %v1532_v39, %v304_v4  ;;  %v1677_v57 = vmul.f32 %v1536_v40, %v305_v8  ;;  %v1683_v61 = vmul.f32 %v1540_v41, %v306_v9  ;;  %v322_v40 = vld [vmem:[%s1463_s7 + $0x18] sm:$0xff]  ;;  %v331_v9 = vld [vmem:[%s1463_s7 + $0x60] sm:$0xff] }
  0x93   : > { %v1686_v37 = vmul.f32 %v1544_v42, %v307_v10  ;;  %v1689_v38 = vmul.f32 %v1548_v43, %v308_v11  ;;  %v1692_v39 = vmul.f32 %v1552_v44, %v309_v12  ;;  %v1698_v0 = vmul.f32 %v1556_v45, %v310_v16  ;;  %v325_v44 = vld [vmem:[%s1463_s7 + $0x30] sm:$0xff] }
  0x94   : > { %v1701_v41 = vmul.f32 %v1560_v46, %v311_v17  ;;  %v1704_v42 = vmul.f32 %v1564_v47, %v312_v22  ;;  %v1707_v43 = vmul.f32 %v1568_v48, %v313_v23  ;;  %v1713_v2 = vmul.f32 %v1572_v49, %v314_v28  ;;  %v328_v48 = vld [vmem:[%s1463_s7 + $0x48] sm:$0xff]  ;;  %v333_v10 = vld [vmem:[%s1463_s7 + $0x70] sm:$0xff] }
  0x95   : > { %v1716_v45 = vmul.f32 %v1576_v50, %v315_v29  ;;  %v1719_v46 = vmul.f32 %v1580_v51, %v316_v34  ;;  %v1722_v47 = vmul.f32 %v1584_v52, %v317_v35  ;;  %v1728_v3 = vmul.f32 %v1588_v53, %v318_v36  ;;  %v332_v50 = vld [vmem:[%s1463_s7 + $0x68] sm:$0xff]  ;;  %v334_v52 = vld [vmem:[%s1463_s7 + $0x78] sm:$0xff] }
  0x96   : > { %v467_v4 = vmul.f32 %v435_v13, %v319_v58  ;;  %v468_v8 = vmul.f32 %v436_v14, %v320_v59  ;;  %v531_v49 = vand.u32 2147483647, %v1671_v55  ;;  %v469_v11 = vmul.f32 %v437_v15, %v321_v60 }
  0x97   : > { %v470_v51 = vmul.f32 %v438_v18, %v322_v40  ;;  %v471_v12 = vmul.f32 %v439_v19, %v323_v62  ;;  %v532_v16 = vand.u32 2147483647, %v1674_v56  ;;  %v472_v17 = vmul.f32 %v440_v20, %v324_v63 }
  0x98   : > { %v473_v22 = vmul.f32 %v441_v21, %v325_v44  ;;  %v474_v23 = vmul.f32 %v442_v24, %v326_v1  ;;  %v475_v28 = vmul.f32 %v443_v25, %v327_v5  ;;  %v476_v29 = vmul.f32 %v444_v26, %v328_v48 }
  0x99   : > { %v477_v53 = vmul.f32 %v445_v27, %v329_v6  ;;  %v1736_v34 = vmul.f32 %v446_v30, %v330_v7  ;;  %v533_v13 = vand.u32 2147483647, %v1677_v57  ;;  %v1739_v14 = vmul.f32 %v447_v31, %v331_v9 }
  0x9a   : > { %v1741_v35 = vmul.f32 %v448_v32, %v332_v50  ;;  %v1743_v15 = vmul.f32 %v449_v33, %v333_v10  ;;  %v547_v18 = vsub.f32 0.0, %v531_v49  ;;  %v1745_v19 = vmul.f32 %v450_v54, %v334_v52 }
  0x9b   : > { %v483_v20 = vmax.f32 %v1671_v55, 0.0  ;;  %v534_v21 = vand.u32 2147483647, %v1683_v61  ;;  %v548_v24 = vsub.f32 0.0, %v532_v16  ;;  %v484_v25 = vmax.f32 %v1674_v56, 0.0 }
  0x9c   : > { %v485_v26 = vmax.f32 %v1677_v57, 0.0  ;;  %v486_v27 = vmax.f32 %v1683_v61, 0.0  ;;  %v487_v30 = vmax.f32 %v1686_v37, 0.0  ;;  %v488_v31 = vmax.f32 %v1689_v38, 0.0 }
  0x9d   : > { %v489_v32 = vmax.f32 %v1692_v39, 0.0  ;;  %v535_v33 = vand.u32 2147483647, %v1686_v37  ;;  %v549_v36 = vsub.f32 0.0, %v533_v13  ;;  %v490_v54 = vmax.f32 %v1698_v0, 0.0 }
  0x9e   : > { %v491_v58 = vmax.f32 %v1701_v41, 0.0  ;;  %v492_v59 = vmax.f32 %v1704_v42, 0.0  ;;  %v563_v60 = vmul.f32 1.442695, %v547_v18  ;;  %v493_v40 = vmax.f32 %v1707_v43, 0.0 }
  0x9f   : > { %v536_v62 = vand.u32 2147483647, %v1689_v38  ;;  %v550_v63 = vsub.f32 0.0, %v534_v21  ;;  %v565_v44 = vmul.f32 1.442695, %v548_v24  ;;  %v494_v1 = vmax.f32 %v1713_v2, 0.0 }
  0xa0   : > { %v537_v49 = vand.u32 2147483647, %v1692_v39  ;;  %v551_v9 = vsub.f32 0.0, %v535_v33  ;;  %v567_v50 = vmul.f32 1.442695, %v549_v36  ;;  %v499_v10 = vmul.f32 %v467_v4, %v1671_v55 }
  0xa1   : > { %v500_v16 = vmul.f32 %v468_v8, %v1674_v56  ;;  %v538_v52 = vand.u32 2147483647, %v1698_v0  ;;  %999 = vpow2.f32 %v563_v60  ;;  %v539_v13 = vand.u32 2147483647, %v1701_v41 }
  0xa2   : > { %v552_v18 = vsub.f32 0.0, %v536_v62  ;;  %1001 = vpow2.f32 %v565_v44  ;;  %v569_v21 = vmul.f32 1.442695, %v550_v63  ;;  %v501_v24 = vmul.f32 %v469_v11, %v1677_v57 }
  0xa3   : > { %v502_v7 = vmul.f32 %v470_v51, %v1683_v61  ;;  %v503_v6 = vmul.f32 %v471_v12, %v1686_v37  ;;  %v540_v33 = vand.u32 2147483647, %v1704_v42  ;;  %v541_v4 = vand.u32 2147483647, %v1707_v43 }
  0xa4   : > { %v553_v36 = vsub.f32 0.0, %v537_v49  ;;  %1003 = vpow2.f32 %v567_v50  ;;  %v571_v8 = vmul.f32 1.442695, %v551_v9  ;;  %v504_v60 = vmul.f32 %v472_v17, %v1689_v38 }
  0xa5   : > { %v505_v48 = vmul.f32 %v473_v22, %v1692_v39  ;;  %v542_v62 = vand.u32 2147483647, %v1713_v2  ;;  %v554_v63 = vsub.f32 0.0, %v538_v52  ;;  %v506_v11 = vmul.f32 %v474_v23, %v1698_v0 }
  0xa6   : > { %v555_v44 = vsub.f32 0.0, %v539_v13  ;;  %1005 = vpow2.f32 %v569_v21  ;;  %v573_v51 = vmul.f32 1.442695, %v552_v18  ;;  %v507_v12 = vmul.f32 %v475_v28, %v1701_v41 }
  0xa7   : > { %v508_v5 = vmul.f32 %v476_v29, %v1704_v42  ;;  %v509_v49 = vmul.f32 %v477_v53, %v1707_v43  ;;  %v556_v50 = vsub.f32 0.0, %v540_v33  ;;  %v543_v9 = vand.u32 2147483647, %v1716_v45 }
  0xa8   : > { %v557_v17 = vsub.f32 0.0, %v541_v4  ;;  %1007 = vpow2.f32 %v571_v8  ;;  %v575_v22 = vmul.f32 1.442695, %v553_v36  ;;  %v510_v52 = vmul.f32 %v1736_v34, %v1713_v2 }
  0xa9   : > { %v1788_v23 = vmul.f32 %v1739_v14, %v1716_v45  ;;  %v558_v13 = vsub.f32 0.0, %v542_v62  ;;  %v577_v18 = vmul.f32 1.442695, %v554_v63  ;;  %v1792_v28 = vmul.f32 %v1741_v35, %v1719_v46 }
  0xaa   : > { %v544_v29 = vand.u32 2147483647, %v1719_v46  ;;  %1009 = vpow2.f32 %v573_v51  ;;  %v579_v53 = vmul.f32 1.442695, %v555_v44  ;;  %v1799_v33 = vmul.f32 %v1743_v15, %v1722_v47 }
  0xab   : > { %v1795_v21 = vpop.eup %999  ;;  %v1803_v34 = vsub.f32 %v483_v20, %v499_v10  ;;  %v1807_v14 = vsub.f32 %v484_v25, %v500_v16  ;;  %v581_v35 = vmul.f32 1.442695, %v556_v50  ;;  %v545_v36 = vand.u32 2147483647, %v1722_v47 }
  0xac   : > { %v1809_v4 = vpop.eup %1001  ;;  %v559_v8 = vsub.f32 0.0, %v543_v9  ;;  %1011 = vpow2.f32 %v575_v22  ;;  %v583_v62 = vmul.f32 1.442695, %v557_v17  ;;  %v1814_v15 = vsub.f32 %v485_v26, %v501_v24 }
  0xad   : > { %v1818_v55 = vsub.f32 %v486_v27, %v502_v7  ;;  %1013 = vpow2.f32 %v577_v18  ;;  %v585_v56 = vmul.f32 1.442695, %v558_v13  ;;  %v546_v25 = vand.u32 2147483647, %v1728_v3 }
  0xae   : > { %v1820_v20 = vpop.eup %1003  ;;  %v560_v10 = vsub.f32 0.0, %v544_v29  ;;  %1015 = vpow2.f32 %v579_v53  ;;  %v595_v16 = vadd.f32 1.0, %v1795_v21  ;;  %v1826_v63 = vsub.f32 %v487_v30, %v503_v6 }
  0xaf   : > { %v1830_v57 = vsub.f32 %v488_v31, %v504_v60  ;;  %1017 = vpow2.f32 %v581_v35  ;;  %v604_v61 = vadd.f32 1.0, %v1809_v4  ;;  %v1837_v27 = vsub.f32 %v489_v32, %v505_v48 }
  0xb0   : > { %v1833_v26 = vpop.eup %1005  ;;  %v561_v7 = vsub.f32 0.0, %v545_v36  ;;  %1019 = vpow2.f32 %v583_v62  ;;  %v587_v24 = vmul.f32 1.442695, %v559_v8  ;;  %v1841_v37 = vsub.f32 %v490_v54, %v506_v11 }
  0xb1   : > { %v1845_v38 = vsub.f32 %v491_v58, %v507_v12  ;;  %1021 = vpow2.f32 %v585_v56  ;;  %v613_v30 = vadd.f32 1.0, %v1820_v20  ;;  %v1852_v39 = vsub.f32 %v492_v59, %v508_v5 }
  0xb2   : > { %v1848_v31 = vpop.eup %1007  ;;  %v562_v32 = vsub.f32 0.0, %v546_v25  ;;  %v589_v48 = vmul.f32 1.442695, %v560_v10  ;;  %1023 = vlog2.f32 %v595_v16  ;;  %v1856_v0 = vsub.f32 %v493_v40, %v509_v49 }
  0xb3   : > { %v598_v41 = vmul.f32 -0.5, %v1795_v21  ;;  %1025 = vlog2.f32 %v604_v61  ;;  %v622_v54 = vadd.f32 1.0, %v1833_v26  ;;  %v1864_v6 = vsub.f32 %v494_v1, %v510_v52 }
  0xb4   : > { %v1860_v58 = vpop.eup %1009  ;;  %1027 = vpow2.f32 %v587_v24  ;;  %v591_v42 = vmul.f32 1.442695, %v561_v7  ;;  %v607_v59 = vmul.f32 -0.5, %v1809_v4  ;;  %v601_v5 = vand.u32 2147483647, %v1795_v21 }
  0xb5   : > { %1029 = vlog2.f32 %v613_v30  ;;  %v616_v43 = vmul.f32 -0.5, %v1820_v20  ;;  %v631_v40 = vadd.f32 1.0, %v1848_v31  ;;  %v593_v11 = vmul.f32 1.442695, %v562_v32 }
  0xb6   : > { %v1870_v60 = vpop.eup %1011  ;;  %1031 = vpow2.f32 %v589_v48  ;;  %v610_v44 = vand.u32 2147483647, %v1809_v4  ;;  %v625_v2 = vmul.f32 -0.5, %v1833_v26  ;;  %v2129_v51 = vmax.f32 %v1716_v45, 0.0 }
  0xb7   : > { %v1874_v1 = vpop.eup %1013  ;;  %v599_v49 = vadd.f32 1.0, %v598_v41  ;;  %1033 = vlog2.f32 %v622_v54  ;;  %v640_v50 = vadd.f32 1.0, %v1860_v58  ;;  %v608_v17 = vadd.f32 1.0, %v607_v59 }
  0xb8   : > { %v1879_v12 = vsub.f32 %v2129_v51, %v1788_v23  ;;  %v1882_v9 = vpop.eup %1015  ;;  %1035 = vpow2.f32 %v591_v42  ;;  %v619_v22 = vand.u32 2147483647, %v1820_v20  ;;  %v634_v52 = vmul.f32 -0.5, %v1848_v31 }
  0xb9   : > { %v1886_v13 = vpop.eup %1017  ;;  %vm1888_vm0 = vcmp.lt.f32.partialorder %v601_v5, 0.0004427343  ;;  %v617_v45 = vadd.f32 1.0, %v616_v43  ;;  %v628_v23 = vand.u32 2147483647, %v1833_v26  ;;  %1037 = vlog2.f32 %v631_v40 }
  0xba   : > { %v649_v29 = vadd.f32 1.0, %v1870_v60  ;;  %v1894_v53 = vpop.eup %1019  ;;  %1039 = vpow2.f32 %v593_v11  ;;  %vm1896_vm1 = vcmp.lt.f32.partialorder %v610_v44, 0.0004427343  ;;  %v626_v36 = vadd.f32 1.0, %v625_v2 }
  0xbb   : > { %v643_v8 = vmul.f32 -0.5, %v1860_v58  ;;  %v1901_v62 = vpop.eup %1021  ;;  %v1904_v56 = vmul.f32 %v1795_v21, %v599_v49  ;;  %v637_v25 = vand.u32 2147483647, %v1848_v31  ;;  %1041 = vlog2.f32 %v640_v50 }
  0xbc   : > { %v658_v10 = vadd.f32 1.0, %v1874_v1  ;;  %v1024_v16 = vpop.eup %1023  ;;  %v609_v61 = vmul.f32 %v1809_v4, %v608_v17  ;;  %vm1909_vm2 = vcmp.lt.f32.partialorder %v619_v22, 0.0004427343  ;;  %v635_v24 = vadd.f32 1.0, %v634_v52 }
  0xbd   : > { %v652_v30 = vmul.f32 -0.5, %v1870_v60  ;;  %v1026_v32 = vpop.eup %1025  ;;  %v1915_v48 = vmul.f32 %v1820_v20, %v617_v45  ;;  %vm1917_vm3 = vcmp.lt.f32.partialorder %v628_v23, 0.0004427343  ;;  %1043 = vlog2.f32 %v649_v29 }
  0xbe   : > { %v667_v41 = vadd.f32 1.0, %v1882_v9  ;;  %v1922_v54 = vpop.eup %1027  ;;  %v1925_v4 = vmul.f32 %v1833_v26, %v626_v36  ;;  %v644_v42 = vadd.f32 1.0, %v643_v8  ;;  %v646_v59 = vand.u32 2147483647, %v1860_v58 }
  0xbf   : > { %v661_v5 = vmul.f32 -0.5, %v1874_v1  ;;  %v1030_v43 = vpop.eup %1029  ;;  %vm1929_vm4 = vcmp.lt.f32.partialorder %v637_v25, 0.0004427343  ;;  %v655_v40 = vand.u32 2147483647, %v1870_v60  ;;  %1045 = vlog2.f32 %v658_v10 }
  0xc0   : > { %v676_v11 = vadd.f32 1.0, %v1886_v13  ;;  %v1935_v44 = vpop.eup %1031  ;;  %v597_v2 = vmul.f32 0.6931472, %v1024_v16  ;;  %v606_v26 = vmul.f32 0.6931472, %v1026_v32  ;;  %v1938_v51 = vmul.f32 %v1848_v31, %v635_v24 }
  0xc1   : > { %v653_v49 = vadd.f32 1.0, %v652_v30  ;;  %v1034_v50 = vpop.eup %1033  ;;  %v664_v17 = vand.u32 2147483647, %v1874_v1  ;;  %1047 = vlog2.f32 %v667_v41  ;;  %v670_v22 = vmul.f32 -0.5, %v1882_v9 }
  0xc2   : > { %v685_v52 = vadd.f32 1.0, %v1894_v53  ;;  %v1943_v45 = vpop.eup %1035  ;;  %v615_v23 = vmul.f32 0.6931472, %v1030_v43  ;;  %v1946_v29 = vmul.f32 %v1860_v58, %v644_v42  ;;  %vm1948_vm5 = vcmp.lt.f32.partialorder %v646_v59, 0.0004427343 }
  0xc3   : > { %v662_v31 = vadd.f32 1.0, %v661_v5  ;;  %v1038_v8 = vpop.eup %1037  ;;  %vm1952_vm6 = vcmp.lt.f32.partialorder %v655_v40, 0.0004427343  ;;  %v673_v10 = vand.u32 2147483647, %v1882_v9  ;;  %1049 = vlog2.f32 %v676_v11 }
  0xc4   : > { %v694_v16 = vadd.f32 1.0, %v1901_v62  ;;  %v1958_v24 = vpop.eup %1039  ;;  %v603_v58 = vsel %vm1888_vm0, %v1904_v56, %v597_v2  ;;  %v612_v30 = vsel %vm1896_vm1, %v609_v61, %v606_v26  ;;  %v624_v32 = vmul.f32 0.6931472, %v1034_v50 }
  0xc5   : > { %v654_v41 = vmul.f32 %v1870_v60, %v653_v49  ;;  %v1042_v42 = vpop.eup %1041  ;;  %vm1966_vm7 = vcmp.lt.f32.partialorder %v664_v17, 0.0004427343  ;;  %v671_v5 = vadd.f32 1.0, %v670_v22  ;;  %1051 = vlog2.f32 %v685_v52 }
  0xc6   : > { %v703_v43 = vadd.f32 1.0, %v1922_v54  ;;  %v621_v18 = vsel %vm1909_vm2, %v1915_v48, %v615_v23  ;;  %v633_v56 = vmul.f32 0.6931472, %v1038_v8  ;;  %v663_v35 = vmul.f32 %v1874_v1, %v662_v31 }
  0xc7   : > { %v679_v61 = vmul.f32 -0.5, %v1886_v13  ;;  %v1044_v40 = vpop.eup %1043  ;;  %vm1976_vm8 = vcmp.lt.f32.partialorder %v673_v10, 0.0004427343  ;;  %1053 = vlog2.f32 %v694_v16  ;;  %v712_v11 = vadd.f32 1.0, %v1935_v44 }
  0xc8   : > { %v739_v2 = vadd.f32 %v603_v58, %v1803_v34  ;;  %v740_v26 = vadd.f32 %v612_v30, %v1807_v14  ;;  %v630_v7 = vsel %vm1917_vm3, %v1925_v4, %v624_v32  ;;  %v642_v48 = vmul.f32 0.6931472, %v1042_v42 }
  0xc9   : > { %v682_v1 = vand.u32 2147483647, %v1886_v13  ;;  %v688_v49 = vmul.f32 -0.5, %v1894_v53  ;;  %v1046_v50 = vpop.eup %1045  ;;  %v672_v17 = vmul.f32 %v1882_v9, %v671_v5  ;;  %1055 = vlog2.f32 %v703_v43 }
  0xca   : > { %v721_v22 = vadd.f32 1.0, %v1943_v45  ;;  %v741_v52 = vadd.f32 %v621_v18, %v1814_v15  ;;  %v639_v34 = vsel %vm1929_vm4, %v1938_v51, %v633_v56  ;;  %v651_v14 = vmul.f32 0.6931472, %v1044_v40 }
  0xcb   : > { %v680_v21 = vadd.f32 1.0, %v679_v61  ;;  %v697_v4 = vmul.f32 -0.5, %v1901_v62  ;;  %v1048_v23 = vpop.eup %1047  ;;  %1057 = vlog2.f32 %v712_v11  ;;  %v730_v31 = vadd.f32 1.0, %v1958_v24 }
  0xcc   : > { %v742_v8 = vadd.f32 %v630_v7, %v1818_v55  ;;  %v756_v9 = vadd.f32 %v740_v26, %v739_v2  ;;  %v648_v10 = vsel %vm1948_vm5, %v1946_v29, %v642_v48  ;;  %v660_v15 = vmul.f32 0.6931472, %v1046_v50 }
  0xcd   : > { %vm2000_vm9 = vcmp.lt.f32.partialorder %v682_v1, 0.0004427343  ;;  %v689_v20 = vadd.f32 1.0, %v688_v49  ;;  %v1050_v51 = vpop.eup %1049  ;;  %v691_v58 = vand.u32 2147483647, %v1894_v53  ;;  %1059 = vlog2.f32 %v721_v22 }
  0xce   : > { %v743_v30 = vadd.f32 %v639_v34, %v1826_v63  ;;  %v757_v32 = vadd.f32 %v756_v9, %v741_v52  ;;  %v657_v55 = vsel %vm1952_vm6, %v654_v41, %v651_v14  ;;  %v669_v42 = vmul.f32 0.6931472, %v1048_v23 }
  0xcf   : > { %v681_v36 = vmul.f32 %v1886_v13, %v680_v21  ;;  %v706_v29 = vmul.f32 -0.5, %v1922_v54  ;;  %v1052_v5 = vpop.eup %1051  ;;  %v698_v43 = vadd.f32 1.0, %v697_v4  ;;  %1061 = vlog2.f32 %v730_v31 }
  0xd0   : > { %v744_v18 = vadd.f32 %v648_v10, %v1830_v57  ;;  %v758_v56 = vadd.f32 %v757_v32, %v742_v8  ;;  %v666_v61 = vsel %vm1966_vm7, %v663_v35, %v660_v15  ;;  %v678_v40 = vmul.f32 0.6931472, %v1050_v51 }
  0xd1   : > { %v700_v63 = vand.u32 2147483647, %v1901_v62  ;;  %v715_v25 = vmul.f32 -0.5, %v1935_v44  ;;  %v1054_v41 = vpop.eup %1053  ;;  %v690_v11 = vmul.f32 %v1894_v53, %v689_v20  ;;  %vm2016_vm10 = vcmp.lt.f32.partialorder %v691_v58, 0.0004427343 }
  0xd2   : > { %v745_v2 = vadd.f32 %v657_v55, %v1837_v27  ;;  %v759_v26 = vadd.f32 %v758_v56, %v743_v30  ;;  %v675_v57 = vsel %vm1976_vm8, %v672_v17, %v669_v42  ;;  %v687_v59 = vmul.f32 0.6931472, %v1052_v5 }
  0xd3   : > { %v707_v35 = vadd.f32 1.0, %v706_v29  ;;  %v724_v7 = vmul.f32 -0.5, %v1943_v45  ;;  %v1056_v48 = vpop.eup %1055  ;;  %v699_v1 = vmul.f32 %v1901_v62, %v698_v43  ;;  %v709_v49 = vand.u32 2147483647, %v1922_v54 }
  0xd4   : > { %v746_v53 = vadd.f32 %v666_v61, %v1841_v37  ;;  %v760_v50 = vadd.f32 %v759_v26, %v744_v18  ;;  %v684_v22 = vsel %vm2000_vm9, %v681_v36, %v678_v40  ;;  %v696_v27 = vmul.f32 0.6931472, %v1054_v41 }
  0xd5   : > { %v716_v52 = vadd.f32 1.0, %v715_v25  ;;  %v733_v60 = vmul.f32 -0.5, %v1958_v24  ;;  %v1058_v17 = vpop.eup %1057  ;;  %vm2030_vm11 = vcmp.lt.f32.partialorder %v700_v63, 0.0004427343  ;;  %v718_v14 = vand.u32 2147483647, %v1935_v44 }
  0xd6   : > { %v747_v62 = vadd.f32 %v675_v57, %v1845_v38  ;;  %v761_v21 = vadd.f32 %v760_v50, %v745_v2  ;;  %v693_v37 = vsel %vm2016_vm10, %v690_v11, %v687_v59  ;;  %v705_v4 = vmul.f32 0.6931472, %v1056_v48 }
  0xd7   : > { %v708_v23 = vmul.f32 %v1922_v54, %v707_v35  ;;  %v725_v31 = vadd.f32 1.0, %v724_v7  ;;  %v1060_v8 = vpop.eup %1059  ;;  %vm2039_vm12 = vcmp.lt.f32.partialorder %v709_v49, 0.0004427343  ;;  %v727_v10 = vand.u32 2147483647, %v1943_v45  ;;  %v755_v35 = vld [vmem:[#allocation2] sm:$0xff] }
  0xd8   : > { %v748_v15 = vadd.f32 %v684_v22, %v1852_v39  ;;  %v762_v16 = vadd.f32 %v761_v21, %v746_v53  ;;  %v702_v38 = vsel %vm2030_vm11, %v699_v1, %v696_v27  ;;  %v714_v20 = vmul.f32 0.6931472, %v1058_v17 }
  0xd9   : > { %v717_v51 = vmul.f32 %v1935_v44, %v716_v52  ;;  %v734_v58 = vadd.f32 1.0, %v733_v60  ;;  %v1062_v30 = vpop.eup %1061  ;;  %vm2048_vm13 = vcmp.lt.f32.partialorder %v718_v14, 0.0004427343  ;;  %v736_v32 = vand.u32 2147483647, %v1958_v24 }
  0xda   : > { %v749_v55 = vadd.f32 %v693_v37, %v1856_v0  ;;  %v763_v42 = vadd.f32 %v762_v16, %v747_v62  ;;  %v514_v39 = vmul.f32 %v1745_v19, %v1728_v3  ;;  %v711_v36 = vsel %vm2039_vm12, %v708_v23, %v705_v4 }
  0xdb   : > { %v723_v29 = vmul.f32 0.6931472, %v1060_v8  ;;  %v726_v44 = vmul.f32 %v1943_v45, %v725_v31  ;;  %v2158_v5 = vmax.f32 %v1719_v46, 0.0  ;;  %vm728_vm14 = vcmp.lt.f32.partialorder %v727_v10, 0.0004427343 }
  0xdc   : > { %v750_v18 = vadd.f32 %v702_v38, %v1864_v6  ;;  %v764_v56 = vadd.f32 %v763_v42, %v748_v15  ;;  %v720_v0 = vsel %vm2048_vm13, %v717_v51, %v714_v20  ;;  %v732_v61 = vmul.f32 0.6931472, %v1062_v30 }
  0xdd   : > { %v528_v43 = vsub.f32 %v2158_v5, %v1792_v28  ;;  %v735_v19 = vmul.f32 %v1958_v24, %v734_v58  ;;  %v2159_v40 = vmax.f32 %v1722_v47, 0.0  ;;  %vm737_vm15 = vcmp.lt.f32.partialorder %v736_v32, 0.0004427343 }
  0xde   : > { %v751_v45 = vadd.f32 %v711_v36, %v1879_v12  ;;  %v765_v25 = vadd.f32 %v764_v56, %v749_v55  ;;  %v729_v46 = vsel %vm728_vm14, %v726_v44, %v723_v29  ;;  %v2160_v28 = vmax.f32 %v1728_v3, 0.0 }
  0xdf   : > { %v529_v63 = vsub.f32 %v2159_v40, %v1799_v33  ;;  %v752_v6 = vadd.f32 %v720_v0, %v528_v43  ;;  %v738_v13 = vsel %vm737_vm15, %v735_v19, %v732_v61 }
  0xe0   : > { %v530_v41 = vsub.f32 %v2160_v28, %v514_v39  ;;  %v766_v11 = vadd.f32 %v765_v25, %v750_v18 }
  0xe1   : > { %v753_v2 = vadd.f32 %v729_v46, %v529_v63 }
  0xe2   : > { %v767_v26 = vadd.f32 %v766_v11, %v751_v45  ;;  %v754_v57 = vadd.f32 %v738_v13, %v530_v41 }
  0xe4   : > { %v768_v59 = vadd.f32 %v767_v26, %v752_v6 }
  0xe6   : > { %v769_v24 = vadd.f32 %v768_v59, %v753_v2  ;;  %776 = sbr.rel (%p915_p2) target bundleno = 245 (0xf5), region = 52 }
  0xe8   : > { %v770_v7 = vadd.f32 %v769_v24, %v754_v57 }
  0xea   : > { %v771_v47 = vadd.f32 %v770_v7, %v755_v35 }
  0xec   : > { %772 = vst [vmem:[#allocation2] sm:$0xff] %v771_v47 }
  0xf3   : > { %v777_v33 = vld [vmem:[#allocation2] sm:$0xff] }
  0xf4   : > { %778 = vst [vmem:[#allocation9] sm:$0xff] %v777_v33 }
  0xf5 PF: > { %p944_p7 = scmp.eq.s32.totalorder %s1296_s18, 1  ;;  %s1246_s22 = smov [#allocation9]  }
  0xf6   : > { %s788_s30 = sshll.u32 %s1246_s22, 4  ;;  %s789_s30 = int_to_ptr.vmem [resolvable:$true] %s788_s30 }
  0xf7   : > { %s1153_s26 = scalar_lea.vmem %s789_s30, 128  ;;  %p1160_p6 = scmp.lt.s32.totalorder %s789_s30, %s789_s30 }
  0xf8   : > { %p1154_p10 = scmp.ne.s32.totalorder %s789_s30, %s1153_s26  ;;  %p1161_p8 = scmp.lt.s32.totalorder %s1153_s26, %s1153_s26 }
  0xfa   : > { %p1155_p3 = pnand %p1154_p10, %p944_p7  ;;  %p1162_p0 = por %p1161_p8, %p1160_p6 }
  0xfc   : > { %p1156_p4 = pneg %p1155_p3 }
  0xfe   : > { %p1163_p5 = pnand %p1162_p0, %p1156_p4 }
 0x100   : > { %1166 = shalt.err (!%p1163_p5)
}
 0x101   : > { %s1167_s12 = scalar_lea.hbm %s2117_s3, 128 }
 0x102   : > { %p1168_p13 = scmp.ne.s32.totalorder %s2117_s3, %s1167_s12  ;;  %p1173_p11 = scmp.lt.u32.totalorder %s1167_s12, %s2117_s3 }
 0x104   : > { %p1169_p1 = pnand %p1168_p13, %p944_p7 }
 0x106   : > { %p1170_p12 = pneg %p1169_p1 }
 0x108   : > { %p1175_p9 = pnand %p1173_p11, %p1170_p12 }
 0x10a   : > { %1178 = shalt.err (!%p1175_p9)
}
 0x10b   : > { %930 = dma.vmem_to_hbm [thread:$0]  (%p944_p7), %s789_s30, 128, %s2117_s3, [#allocation5]  }
 0x10c   : > { %1212 = dma.done.wait (%p944_p7), [#allocation5], 128  }
 0x10d   : > { %1214 = vsyncadd (%p944_p7), [#allocation5], 4294967168 }
 0x10e PF: > { %s20_s17 = sadd.s32 1, %s1237_s17   ;;  %s2161_s12 = smov %s1221_s13 }
 0x10f   : > { %p17_p2 = scmp.ge.s32.totalorder %s20_s17, 4   ;;  %s2162_s13 = smov %s1225_s14 }
 0x110   : > { %s2163_s14 = smov %s1315_s23  ;;  %s2164_s15 = smov %s1233_s16 }
 0x111   : > { %s2165_s16 = smov %s2167_s19  ;;  %19 = sbr.rel (!%p17_p2) target bundleno = 7 (0x7), region = 102 }
 0x118   :  { %801 = vsyncpa [#allocation4], 1 }
 0x119   :  { %803 = vsyncpa [#allocation4 + $0x1], 1 }
 0x11a   :  { %804 = vsyncpa [#allocation7], 1 }
 0x11b   :  { %806 = vsyncpa [#allocation7 + $0x1], 1 }
 0x11c   :  { %807 = vsyncpa [#allocation5], 1 }
 0x11d   :  { %809 = vsyncpa [#allocation5 + $0x1], 1 }

</bundles_post_ra>
